<compile_context>
chip_gen: v6e
topology: v6e:2x2x1
jax: 0.10.0
libtpu: 0.0.40
codegen_flags: <defaults>
</compile_context>

<pallas_src>
import functools

import jax
import jax.numpy as jnp
from jax.experimental import pallas as pl
from jax.experimental.pallas import tpu as pltpu

_NEG = -1e30  # "minus infinity" that stays finite through exp/where math


# ----------------------------------------------------------------------------
# Kernel 1: CLIP contrastive loss (world_size == 1 branch of ClipLoss)
# ----------------------------------------------------------------------------
def _clip_loss_kernel(scale_ref, img_ref, txt_ref, out_ref):
    img = img_ref[...].astype(jnp.float32)                      # (B, D)
    txt = txt_ref[...].astype(jnp.float32)                      # (B, D)

    # F.normalize(p=2, dim=-1): x / max(||x||, eps)  ==  x * rsqrt(max(x.x, eps^2))
    eps2 = 1e-24
    scale = scale_ref[0, 0]
    # Fold logit_scale into the image-row scale: one fewer (B, D) elementwise pass.
    img_s = img * (scale * jax.lax.rsqrt(
        jnp.maximum(jnp.sum(img * img, axis=-1, keepdims=True), eps2)))
    txt_n = txt * jax.lax.rsqrt(
        jnp.maximum(jnp.sum(txt * txt, axis=-1, keepdims=True), eps2))

    # MXU matmul with bf16 operands, f32 accumulation.
    s = jnp.dot(img_s.astype(jnp.bfloat16), txt_n.astype(jnp.bfloat16).T,
                preferred_element_type=jnp.float32)             # (B, B)
    b = s.shape[0]

    # CE(logits_per_image, arange(B)): rows, diagonal targets.
    row_max = jnp.max(s, axis=-1, keepdims=True)
    lse_row = jnp.log(jnp.sum(jnp.exp(s - row_max), axis=-1, keepdims=True)) + row_max
    # CE(logits_per_text, arange(B)) == CE over columns of s with diagonal targets
    # (logits_per_text is exactly s.T in the world_size == 1 branch).
    col_max = jnp.max(s, axis=0, keepdims=True)
    lse_col = jnp.log(jnp.sum(jnp.exp(s - col_max), axis=0, keepdims=True)) + col_max

    ri = jax.lax.broadcasted_iota(jnp.int32, s.shape, 0)
    ci = jax.lax.broadcasted_iota(jnp.int32, s.shape, 1)
    diag_sum = jnp.sum(jnp.where(ri == ci, s, 0.0))

    loss_img = (jnp.sum(lse_row) - diag_sum) / b
    loss_txt = (jnp.sum(lse_col) - diag_sum) / b
    # Lane-dense (1, 128) store; caller reads [0, 0].
    out_ref[...] = jnp.full(out_ref.shape, 0.5 * (loss_img + loss_txt),
                            dtype=jnp.float32)


def clip_loss(image_features, text_features, logit_scale):
    b, d = image_features.shape
    scale = jnp.asarray(logit_scale, jnp.float32).reshape(1, 1)
    itemsize = jnp.dtype(image_features.dtype).itemsize
    cost = pl.CostEstimate(
        flops=4 * b * b * d + 16 * b * b + 8 * b * d,
        transcendentals=2 * b * b,
        bytes_accessed=2 * b * d * itemsize + 512,
    )
    out = pl.pallas_call(
        _clip_loss_kernel,
        out_shape=jax.ShapeDtypeStruct((1, 128), jnp.float32),
        in_specs=[
            pl.BlockSpec(memory_space=pltpu.SMEM),   # logit_scale scalar
            pl.BlockSpec(memory_space=pltpu.VMEM),   # image_features
            pl.BlockSpec(memory_space=pltpu.VMEM),   # text_features
        ],
        out_specs=pl.BlockSpec(memory_space=pltpu.VMEM),
        compiler_params=pltpu.CompilerParams(vmem_limit_bytes=64 * 1024 * 1024),
        cost_estimate=cost,
    )(scale, image_features, text_features)
    return out[0, 0]


# ----------------------------------------------------------------------------
# Kernel 2: caption cross-entropy with ignore_index (nn.CrossEntropyLoss)
#   Tiled over (row tiles, vocab tiles) with streaming log-sum-exp over vocab.
#   Emits per-row-tile partial (loss_sum, valid_count); reduced in JAX so the
#   row axis can be "parallel" (both TensorCores on v7x).
# ----------------------------------------------------------------------------
def _caption_ce_kernel(labels_ref, logits_ref, sum_ref, cnt_ref,
                       m_ref, l_ref, t_ref, *, n_rows, n_vocab, pad_id):
    i = pl.program_id(0)                 # row tile (parallel)
    j = pl.program_id(1)                 # vocab tile (arbitrary, inner)
    nj = pl.num_programs(1)

    tn, tv = logits_ref.shape
    # Global row / vocab indices: mask overhanging tiles against true N / V.
    row_g = i * tn + jax.lax.broadcasted_iota(jnp.int32, (tn, 1), 0)       # (tn, 1)
    col_g = j * tv + jax.lax.broadcasted_iota(jnp.int32, (tn, tv), 1)      # (tn, tv)
    row_ok = row_g < n_rows
    col_ok = col_g < n_vocab

    labels = labels_ref[...]                                               # (tn, 1) i32
    x = jnp.where(col_ok & row_ok, logits_ref[...].astype(jnp.float32), _NEG)

    @pl.when(j == 0)
    def _():
        m_ref[...] = jnp.full(m_ref.shape, _NEG, dtype=m_ref.dtype)
        l_ref[...] = jnp.zeros(l_ref.shape, dtype=l_ref.dtype)
        t_ref[...] = jnp.zeros(t_ref.shape, dtype=t_ref.dtype)

    # Streaming (online) log-sum-exp over vocab tiles.
    m_prev = m_ref[...]
    m_new = jnp.maximum(m_prev, jnp.max(x, axis=-1, keepdims=True))
    alpha = jnp.exp(m_prev - m_new)
    l_ref[...] = alpha * l_ref[...] + jnp.sum(jnp.exp(x - m_new), axis=-1,
                                              keepdims=True)
    m_ref[...] = m_new

    # Target-logit gather: masked where-sum (no N x V one-hot multiply).
    t_ref[...] += jnp.sum(jnp.where(col_g == labels, x, 0.0), axis=-1,
                          keepdims=True)

    @pl.when(j == nj - 1)
    def _():
        valid = row_ok & (labels != pad_id)                                # (tn, 1)
        lse = m_ref[...] + jnp.log(l_ref[...])
        per_row = jnp.where(valid, lse - t_ref[...], 0.0)
        # Lane-dense (1, 8, 128) partials; host reduces element [0, 0].
        sum_ref[...] = jnp.full(sum_ref.shape, jnp.sum(per_row), dtype=jnp.float32)
        cnt_ref[...] = jnp.full(cnt_ref.shape,
                                jnp.sum(valid.astype(jnp.float32)),
                                dtype=jnp.float32)


def caption_loss(logits, labels, pad_id=0, tile_n=256, tile_v=2048):
    b, t, v = logits.shape
    n = b * t
    logits2d = logits.reshape(n, v)
    labels2d = labels.astype(jnp.int32).reshape(n, 1)

    # Block dims must be divisible by (8, 128) or equal the full dim; using the
    # full dim when the array is smaller than the tile satisfies both cases.
    tn = n if n <= tile_n else tile_n
    tv = v if v <= tile_v else tile_v
    n_rt = pl.cdiv(n, tn)
    n_vt = pl.cdiv(v, tv)

    itemsize = jnp.dtype(logits.dtype).itemsize
    cost = pl.CostEstimate(
        flops=6 * n * v,
        transcendentals=n * v,
        bytes_accessed=n * v * itemsize + n * 4 + 2 * n_rt * 8 * 128 * 4,
    )

    grid_spec = pltpu.PrefetchScalarGridSpec(
        num_scalar_prefetch=0,
        grid=(n_rt, n_vt),
        in_specs=[
            pl.BlockSpec((tn, 1), lambda i, j: (i, 0)),      # labels (per-row tile)
            pl.BlockSpec((tn, tv), lambda i, j: (i, j)),     # logits tile
        ],
        out_specs=[
            pl.BlockSpec((1, 8, 128), lambda i, j: (i, 0, 0)),   # partial loss sums
            pl.BlockSpec((1, 8, 128), lambda i, j: (i, 0, 0)),   # partial valid counts
        ],
        scratch_shapes=[
            pltpu.VMEM((tn, 1), jnp.float32),   # running max  m
            pltpu.VMEM((tn, 1), jnp.float32),   # running sum  l
            pltpu.VMEM((tn, 1), jnp.float32),   # target logit accumulator
        ],
    )

    sum_p, cnt_p = pl.pallas_call(
        functools.partial(_caption_ce_kernel, n_rows=n, n_vocab=v, pad_id=pad_id),
        out_shape=(jax.ShapeDtypeStruct((n_rt, 8, 128), jnp.float32),
                   jax.ShapeDtypeStruct((n_rt, 8, 128), jnp.float32)),
        grid_spec=grid_spec,
        compiler_params=pltpu.CompilerParams(
            dimension_semantics=("parallel", "arbitrary"),
            vmem_limit_bytes=32 * 1024 * 1024),
        cost_estimate=cost,
    )(labels2d, logits2d)

    loss_sum = jnp.sum(sum_p[:, 0, 0])
    count = jnp.sum(cnt_p[:, 0, 0])
    # Mean over non-ignored tokens; NaN if every label == pad_id (matches PyTorch).
    return loss_sum / count


# ----------------------------------------------------------------------------
# CoCaLoss forward
# ----------------------------------------------------------------------------
def coca_loss(image_features, text_features, logits, labels, logit_scale,
              caption_loss_weight=2.0, clip_loss_weight=1.0, pad_id=0,
              tile_n=256, tile_v=2048):
    if clip_loss_weight:
        cl = clip_loss_weight * clip_loss(image_features, text_features, logit_scale)
    else:
        cl = jnp.float32(0.0)
    cap = caption_loss_weight * caption_loss(logits, labels, pad_id=pad_id,
                                             tile_n=tile_n, tile_v=tile_v)
    return cl, cap


if __name__ == "__main__":
    key = jax.random.PRNGKey(0)
    k1, k2, k3, k4 = jax.random.split(key, 4)

    B, D = 8, 64        # batch, embedding dim
    T, V = 16, 256      # caption length, vocab size  (B*T = 128 rows)
    pad_id = 0

    image_features = jax.random.normal(k1, (B, D), dtype=jnp.float32)
    text_features = jax.random.normal(k2, (B, D), dtype=jnp.float32)
    # bf16 caption logits in HBM (halves memory traffic); kernel accumulates in f32.
    cap_logits = jax.random.normal(k3, (B, T, V), dtype=jnp.float32).astype(jnp.bfloat16)
    cap_labels = jax.random.randint(k4, (B, T), 0, V, dtype=jnp.int32)

    logit_scale = jnp.float32(jnp.log(1.0 / 0.07))

    # Small tiles so the demo exercises the (row, vocab) grid + streaming LSE.
    cl, cap = coca_loss(image_features, text_features, cap_logits, cap_labels,
                        logit_scale, caption_loss_weight=2.0, clip_loss_weight=1.0,
                        pad_id=pad_id, tile_n=64, tile_v=128)
    jax.block_until_ready((cl, cap))
    print("KERNEL_OK")
</pallas_src>

<mosaic_0001>
module attributes {stable_mosaic.version = 11 : i64} {
  func.func @_clip_loss_kernel(%arg0: memref<1x1xf32, #tpu.memory_space<smem>>, %arg1: memref<8x64xf32, #tpu.memory_space<vmem>>, %arg2: memref<8x64xf32, #tpu.memory_space<vmem>>, %arg3: memref<1x128xf32, #tpu.memory_space<vmem>>) attributes {dimension_semantics = [], scalar_prefetch = 0 : i64, scratch_operands = 0 : i64, tpu.core_type = #tpu.core_type<tc>} {
    %c0 = arith.constant 0 : index
    %c0_0 = arith.constant 0 : index
    %0 = vector.load %arg1[%c0, %c0_0] : memref<8x64xf32, #tpu.memory_space<vmem>>, vector<8x64xf32>
    %c0_1 = arith.constant 0 : index
    %c0_2 = arith.constant 0 : index
    %1 = vector.load %arg2[%c0_1, %c0_2] : memref<8x64xf32, #tpu.memory_space<vmem>>, vector<8x64xf32>
    %c0_3 = arith.constant 0 : index
    %c0_4 = arith.constant 0 : index
    %2 = memref.load %arg0[%c0_3, %c0_4] : memref<1x1xf32, #tpu.memory_space<smem>>
    %3 = arith.mulf %0, %0 : vector<8x64xf32>
    %cst = arith.constant dense<0.000000e+00> : vector<8xf32>
    %4 = vector.multi_reduction <add>, %3, %cst [1] : vector<8x64xf32> to vector<8xf32>
    %5 = vector.shape_cast %4 : vector<8xf32> to vector<8x1xf32>
    %cst_5 = arith.constant 1.000000e-24 : f32
    %6 = vector.broadcast %cst_5 : f32 to vector<8x1xf32>
    %7 = arith.maximumf %5, %6 : vector<8x1xf32>
    %8 = math.rsqrt %7 : vector<8x1xf32>
    %9 = vector.broadcast %2 : f32 to vector<8x1xf32>
    %10 = arith.mulf %9, %8 : vector<8x1xf32>
    %11 = vector.broadcast %10 : vector<8x1xf32> to vector<8x64xf32>
    %12 = arith.mulf %0, %11 : vector<8x64xf32>
    %13 = arith.mulf %1, %1 : vector<8x64xf32>
    %cst_6 = arith.constant dense<0.000000e+00> : vector<8xf32>
    %14 = vector.multi_reduction <add>, %13, %cst_6 [1] : vector<8x64xf32> to vector<8xf32>
    %15 = vector.shape_cast %14 : vector<8xf32> to vector<8x1xf32>
    %cst_7 = arith.constant 1.000000e-24 : f32
    %16 = vector.broadcast %cst_7 : f32 to vector<8x1xf32>
    %17 = arith.maximumf %15, %16 : vector<8x1xf32>
    %18 = math.rsqrt %17 : vector<8x1xf32>
    %19 = vector.broadcast %18 : vector<8x1xf32> to vector<8x64xf32>
    %20 = arith.mulf %1, %19 : vector<8x64xf32>
    %21 = arith.truncf %12 : vector<8x64xf32> to vector<8x64xbf16>
    %22 = arith.truncf %20 : vector<8x64xf32> to vector<8x64xbf16>
    %23 = tpu.transpose %22, [1, 0] : vector<8x64xbf16> -> vector<64x8xbf16>
    %cst_8 = arith.constant dense<0.000000e+00> : vector<8x8xf32>
    %24 = tpu.matmul %21, %23, %cst_8 {dimension_numbers = #tpu.dot_dimension_numbers<[1], [0], [0], [1], [0, 0, 1, 1], [], []>} : vector<8x64xbf16>, vector<64x8xbf16>, vector<8x8xf32> -> vector<8x8xf32>
    %cst_9 = arith.constant dense<0xFF800000> : vector<8xf32>
    %25 = vector.multi_reduction <maximumf>, %24, %cst_9 [1] : vector<8x8xf32> to vector<8xf32>
    %26 = vector.shape_cast %25 : vector<8xf32> to vector<8x1xf32>
    %27 = vector.broadcast %26 : vector<8x1xf32> to vector<8x8xf32>
    %28 = arith.subf %24, %27 : vector<8x8xf32>
    %29 = math.exp %28 : vector<8x8xf32>
    %cst_10 = arith.constant dense<0.000000e+00> : vector<8xf32>
    %30 = vector.multi_reduction <add>, %29, %cst_10 [1] : vector<8x8xf32> to vector<8xf32>
    %31 = vector.shape_cast %30 : vector<8xf32> to vector<8x1xf32>
    %32 = math.log %31 : vector<8x1xf32>
    %33 = arith.addf %32, %26 : vector<8x1xf32>
    %cst_11 = arith.constant dense<0xFF800000> : vector<8xf32>
    %34 = vector.multi_reduction <maximumf>, %24, %cst_11 [0] : vector<8x8xf32> to vector<8xf32>
    %35 = vector.shape_cast %34 : vector<8xf32> to vector<1x8xf32>
    %36 = vector.broadcast %35 : vector<1x8xf32> to vector<8x8xf32>
    %37 = arith.subf %24, %36 : vector<8x8xf32>
    %38 = math.exp %37 : vector<8x8xf32>
    %cst_12 = arith.constant dense<0.000000e+00> : vector<8xf32>
    %39 = vector.multi_reduction <add>, %38, %cst_12 [0] : vector<8x8xf32> to vector<8xf32>
    %40 = vector.shape_cast %39 : vector<8xf32> to vector<1x8xf32>
    %41 = math.log %40 : vector<1x8xf32>
    %42 = arith.addf %41, %35 : vector<1x8xf32>
    %43 = tpu.iota {dimensions = array<i32: 0>} : vector<8x8xi32>
    %44 = tpu.iota {dimensions = array<i32: 1>} : vector<8x8xi32>
    %45 = arith.cmpi eq, %43, %44 : vector<8x8xi32>
    %cst_13 = arith.constant 0.000000e+00 : f32
    %46 = vector.broadcast %cst_13 : f32 to vector<8x8xf32>
    %47 = arith.select %45, %24, %46 : vector<8x8xi1>, vector<8x8xf32>
    %48 = vector.shape_cast %47 : vector<8x8xf32> to vector<1x8x8xf32>
    %cst_14 = arith.constant dense<0.000000e+00> : vector<1xf32>
    %49 = vector.multi_reduction <add>, %48, %cst_14 [1, 2] : vector<1x8x8xf32> to vector<1xf32>
    %50 = vector.shape_cast %49 : vector<1xf32> to vector<1x1x1xf32>
    %51 = vector.extract %50[0, 0, 0] : f32 from vector<1x1x1xf32>
    %52 = vector.shape_cast %33 : vector<8x1xf32> to vector<1x8x1xf32>
    %cst_15 = arith.constant dense<0.000000e+00> : vector<1xf32>
    %53 = vector.multi_reduction <add>, %52, %cst_15 [1, 2] : vector<1x8x1xf32> to vector<1xf32>
    %54 = vector.shape_cast %53 : vector<1xf32> to vector<1x1x1xf32>
    %55 = vector.extract %54[0, 0, 0] : f32 from vector<1x1x1xf32>
    %56 = arith.subf %55, %51 : f32
    %cst_16 = arith.constant 8.000000e+00 : f32
    %57 = arith.divf %56, %cst_16 : f32
    %58 = vector.shape_cast %42 : vector<1x8xf32> to vector<1x1x8xf32>
    %cst_17 = arith.constant dense<0.000000e+00> : vector<1xf32>
    %59 = vector.multi_reduction <add>, %58, %cst_17 [1, 2] : vector<1x1x8xf32> to vector<1xf32>
    %60 = vector.shape_cast %59 : vector<1xf32> to vector<1x1x1xf32>
    %61 = vector.extract %60[0, 0, 0] : f32 from vector<1x1x1xf32>
    %62 = arith.subf %61, %51 : f32
    %cst_18 = arith.constant 8.000000e+00 : f32
    %63 = arith.divf %62, %cst_18 : f32
    %64 = arith.addf %57, %63 : f32
    %cst_19 = arith.constant 5.000000e-01 : f32
    %65 = arith.mulf %cst_19, %64 : f32
    %66 = vector.broadcast %65 : f32 to vector<1x128xf32>
    %c0_20 = arith.constant 0 : index
    %c0_21 = arith.constant 0 : index
    %67 = vector.load %arg3[%c0_20, %c0_21] : memref<1x128xf32, #tpu.memory_space<vmem>>, vector<1x128xf32>
    tpu.vector_store %arg3[%c0_20, %c0_21], %66 {strides = array<i32>} : memref<1x128xf32, #tpu.memory_space<vmem>>, vector<1x128xf32>,
    return
  }
}

</mosaic_0001>

<bundles_post_ra>
// kernel: tpu_custom_call.1
= control target key start
LH: loop header
LB: loop body
LE: loop exit
PB: predicated region body
PF: predicated region fallthrough
CT: control target
= control target key end

     0   :  { %9 = vsyncpa [#allocation4], 0  ;;  %s350_s0 = inlined_call_operand.<no memory space> [shape: f32[1,1], index: 0, kind: input, shape index: {}]   ;;  %s351_s1 = inlined_call_operand.hbm [shape: f32[8,64], index: 1, kind: input, shape index: {}]   ;;  %s352_s2 = inlined_call_operand.hbm [shape: f32[8,64], index: 2, kind: input, shape index: {}]   ;;  %s353_s3 = inlined_call_operand.hbm [shape: f32[1,128], index: 3, kind: output, shape index: {}]  }
   0x1   :  { %10 = vsyncpa [#allocation7], 0 }
   0x2   :  { %11 = vsyncpa [#allocation5], 0  ;;  %s305_s12 = smov [#allocation3]   ;;  %s306_s14 = smov [#allocation6]  }
   0x3   :  { %s20_s13 = sshll.u32 %s305_s12, 4  ;;  %s30_s15 = sshll.u32 %s306_s14, 4  ;;  %s21_s13 = int_to_ptr.vmem [resolvable:$true] %s20_s13  ;;  %s31_s15 = int_to_ptr.vmem [resolvable:$true] %s30_s15 }
   0x4   :  { %s247_s16 = scalar_lea.vmem %s21_s13, 128  ;;  %p252_p1 = scmp.lt.s32.totalorder %s21_s13, %s21_s13 }
   0x5   :  { %p248_p0 = scmp.ne.s32.totalorder %s21_s13, %s247_s16  ;;  %p253_p2 = scmp.lt.s32.totalorder %s247_s16, %s247_s16 }
   0x7   :  { %p254_p3 = por %p253_p2, %p252_p1 }
   0x9   :  { %p255_p4 = pnand %p254_p3, %p248_p0 }
   0xb   :  { %258 = shalt.err (!%p255_p4)
}
   0xc   :  { %23 = dma.hbm_to_vmem [thread:$0]  %s351_s1, 128, %s21_s13, [#allocation4]  }
   0xd   :  { %s267_s19 = scalar_lea.vmem %s31_s15, 128  ;;  %p272_p6 = scmp.lt.s32.totalorder %s31_s15, %s31_s15 }
   0xe   :  { %p268_p5 = scmp.ne.s32.totalorder %s31_s15, %s267_s19  ;;  %p273_p7 = scmp.lt.s32.totalorder %s267_s19, %s267_s19 }
  0x10   :  { %p274_p8 = por %p273_p7, %p272_p6 }
  0x12   :  { %p275_p9 = pnand %p274_p8, %p268_p5 }
  0x14   :  { %278 = shalt.err (!%p275_p9)
}
  0x15   :  { %33 = dma.hbm_to_vmem [thread:$0]  %s352_s2, 128, %s31_s15, [#allocation7]  }
  0x16   :  { %299 = dma.done.wait [#allocation4], 128  }
  0x17   :  { %300 = vsyncadd [#allocation4], 4294967168 }
  0x18   :  { %301 = dma.done.wait [#allocation7], 128  }
  0x19   :  { %302 = vsyncadd [#allocation7], 4294967168  ;;  %v42_v0 = vld [vmem:[#allocation6] sm:$0xff]  ;;  %vm45_vm0 = vcmask 523264   ;;  %v41_v1 = vld [vmem:[#allocation3] sm:$0xff]  ;;  %v307_v6 = vmov 0.0   ;;  %v51_v13 = vstv %s350_s0  ;;  %v141_v20 = vlaneseq }
  0x1a   :  { %v54_v2 = vmul.f32 %v42_v0, %v42_v0  ;;  %v44_v3 = vmul.f32 %v41_v1, %v41_v1  ;;  %210 = vmatprep.subr.bf16.mxu0 %v307_v6  ;;  %vm308_vm1 = vmmov 0   ;;  %vm109_vm2 = vcmask 64512   ;;  %s309_s29 = smov [#allocation8]  }
  0x1b   :  { %212 = vmatprep.mubr.msk.bf16.mxu0 %vm308_vm1, %v307_v6  ;;  %v142_v21 = vshrl.u32 %v141_v20, 7  ;;  %v144_v22 = vand.u32 127, %v141_v20  ;;  %vm172_vm4 = vcmask 57344   ;;  %vm157_vm5 = vcmask 7168   ;;  %s197_s30 = sshll.u32 %s309_s29, 4  ;;  %s198_s30 = int_to_ptr.vmem [resolvable:$true] %s197_s30 }
  0x1c   :  { %v55_v4 = vsel %vm45_vm0, %v54_v2, 0.0  ;;  %v46_v5 = vsel %vm45_vm0, %v44_v3, 0.0  ;;  %s279_s5 = scalar_lea.vmem %s198_s30, 16  ;;  %s283_s6 = scalar_lea.vmem %s198_s30, 32 }
  0x1d   :  { %56 = vadd.xlane.f32.xlu0 %v55_v4  ;;  %vm145_vm3 = vcmp.eq.s32.totalorder %v142_v21, %v144_v22  ;;  %p280_p10 = scmp.ne.s32.totalorder %s198_s30, %s279_s5  ;;  %p284_p11 = scmp.lt.s32.totalorder %s198_s30, %s198_s30 }
  0x1e   :  { %p285_p12 = scmp.lt.s32.totalorder %s283_s6, %s279_s5 }
  0x20   :  { %p286_p13 = por %p285_p12, %p284_p11 }
  0x21   :  { %47 = vadd.xlane.f32.xlu0 %v46_v5 }
  0x22   :  { %p287_p0 = pnand %p286_p13, %p280_p10 }
  0xa6   :  { %v57_v7 = vpop.xlane.xlu0 %56 }
  0xa7   :  { %v58_v8 = vmax.f32 %v57_v7, 1e-24 }
  0xa9   :  { %227 = vrsqrt.f32 %v58_v8 }
  0xaa   :  { %v48_v9 = vpop.xlane.xlu0 %47 }
  0xab   :  { %v49_v10 = vmax.f32 %v48_v9, 1e-24 }
  0xad   :  { %229 = vrsqrt.f32 %v49_v10 }
  0xb6   :  { %v228_v11 = vpop.eup %227 }
  0xb7   :  { %v60_v12 = vmul.f32 %v228_v11, %v42_v0 }
  0xb9   :  { %v62_v14 = vpack.c.bf16 %v60_v12, %v60_v12 }
  0xba   :  { %v230_v15 = vpop.eup %229 }
  0xbb   :  { %v67_v16 = vsel %vm45_vm0, %v62_v14, 0  ;;  %v52_v17 = vmul.f32 %v230_v15, %v51_v13 }
  0xbc   :  { %211 = vmatpush3.bf16.xpose.msra.mxu0 %v67_v16 }
  0xbd   :  { %v53_v18 = vmul.f32 %v52_v17, %v41_v1 }
  0xbf   :  { %v61_v19 = vpack.c.bf16 %v53_v18, %v53_v18 }
  0xc3   :  { %213 = vmatmul.mubr.msk.bf16.vlgmr.msra.gmra.mxu0 %vm45_vm0, %v61_v19 }
 0x183   :  { %v103_v23 = vpop.f32.mrf.mxu0 }
 0x184   :  { %v110_v24 = vsel %vm109_vm2, %v103_v23, -inf  ;;  %v146_v25 = vsel %vm145_vm3, %v103_v23, 0.0 }
 0x185   :  { %111 = vmax.xlane.f32.xlu1 %v110_v24  ;;  %v122_v26 = vrot.slane %v110_v24, 4  ;;  %v214_v27 = vpop.f32.mrf.mxu0  ;;  %v147_v28 = vsel %vm109_vm2, %v146_v25, 0.0 }
 0x186   :  { %148 = vadd.xlane.f32.xlu0 %v147_v28 }
 0x187   :  { %v123_v29 = vmax.f32 %v110_v24, %v122_v26  ;;  %v106_v30 = vpop.f32.mrf.mxu0 }
 0x189   :  { %v124_v31 = vrot.slane %v123_v29, 2  ;;  %v215_v32 = vpop.f32.mrf.mxu0 }
 0x18b   :  { %v125_v33 = vmax.f32 %v123_v29, %v124_v31 }
 0x18d   :  { %v126_v34 = vrot.slane %v125_v33, 1 }
 0x18f   :  { %v127_v35 = vmax.f32 %v125_v33, %v126_v34 }
 0x191   :  { %v128_v36 = vsub.f32 %v103_v23, %v127_v35 }
 0x193   :  { %v129_v37 = vmul.f32 1.442695, %v128_v36 }
 0x195   :  { %231 = vpow2.f32 %v129_v37 }
 0x1a2   :  { %v232_v38 = vpop.eup %231 }
 0x1a3   :  { %v131_v39 = vsel %vm109_vm2, %v232_v38, 0.0 }
 0x1a4   :  { %v132_v40 = vrot.slane %v131_v39, 4 }
 0x1a6   :  { %v133_v41 = vadd.f32 %v132_v40, %v131_v39 }
 0x1a8   :  { %v134_v42 = vrot.slane %v133_v41, 2 }
 0x1aa   :  { %v135_v43 = vadd.f32 %v134_v42, %v133_v41 }
 0x1ac   :  { %v136_v44 = vrot.slane %v135_v43, 1 }
 0x1ae   :  { %v137_v45 = vadd.f32 %v136_v44, %v135_v43 }
 0x1b0   :  { %233 = vlog2.f32 %v137_v45 }
 0x1bd   :  { %v234_v46 = vpop.eup %233 }
 0x1be   :  { %v139_v47 = vmul.f32 0.6931472, %v234_v46 }
 0x1c0   :  { %v140_v48 = vadd.f32 %v139_v47, %v127_v35 }
 0x1c2   :  { %v173_v49 = vsel %vm172_vm4, %v140_v48, 0.0 }
 0x1c3   :  { %174 = vadd.xlane.f32.xlu0 %v173_v49 }
 0x20e   :  { %v112_v50 = vpop.xlane.xlu1 %111 }
 0x20f   :  { %v113_v51 = vsub.f32 %v103_v23, %v112_v50  ;;  %v149_v52 = vpop.xlane.xlu0 %148 }
 0x210   :  { %v150_v53 = vrot.slane %v149_v52, 4 }
 0x211   :  { %v114_v54 = vmul.f32 1.442695, %v113_v51 }
 0x212   :  { %v151_v55 = vadd.f32 %v150_v53, %v149_v52 }
 0x213   :  { %235 = vpow2.f32 %v114_v54 }
 0x214   :  { %v152_v56 = vrot.slane %v151_v55, 2 }
 0x216   :  { %v153_v57 = vadd.f32 %v152_v56, %v151_v55 }
 0x218   :  { %v154_v58 = vrot.slane %v153_v57, 1 }
 0x21a   :  { %v155_v59 = vadd.f32 %v154_v58, %v153_v57 }
 0x21c   :  { %216 = vpush %v155_v59 }
 0x220   :  { %v236_v60 = vpop.eup %235 }
 0x221   :  { %v116_v61 = vsel %vm109_vm2, %v236_v60, 0.0 }
 0x222   :  { %117 = vadd.xlane.f32.xlu1 %v116_v61 }
 0x24c   :  { %v175_v3 = vpop.xlane.xlu0 %174 }
 0x24d   :  { %v176_v4 = vrot.slane %v175_v3, 4  ;;  %s217_s0 = spop %216 }
 0x24f   :  { %v177_v5 = vadd.f32 %v176_v4, %v175_v3 }
 0x251   :  { %v178_v6 = vrot.slane %v177_v5, 2 }
 0x253   :  { %v179_v10 = vadd.f32 %v178_v6, %v177_v5 }
 0x255   :  { %v180_v13 = vrot.slane %v179_v10, 1 }
 0x257   :  { %v181_v16 = vadd.f32 %v180_v13, %v179_v10 }
 0x2ab   :  { %v118_v62 = vpop.xlane.xlu1 %117 }
 0x2ac   :  { %237 = vlog2.f32 %v118_v62 }
 0x2b9   :  { %v238_v63 = vpop.eup %237 }
 0x2ba   :  { %v120_v0 = vmul.f32 0.6931472, %v238_v63 }
 0x2bc   :  { %v121_v1 = vadd.f32 %v120_v0, %v112_v50 }
 0x2be   :  { %v158_v2 = vsel %vm157_vm5, %v121_v1, 0.0 }
 0x2bf   :  { %159 = vadd.xlane.f32.xlu1 %v158_v2 }
 0x348   :  { %v160_v7 = vpop.xlane.xlu1 %159 }
 0x349   :  { %v161_v8 = vrot.slane %v160_v7, 4 }
 0x34b   :  { %v162_v9 = vadd.f32 %v161_v8, %v160_v7 }
 0x34d   :  { %v163_v11 = vrot.slane %v162_v9, 2 }
 0x34f   :  { %v164_v12 = vadd.f32 %v163_v11, %v162_v9 }
 0x351   :  { %v165_v14 = vrot.slane %v164_v12, 1 }
 0x353   :  { %v166_v15 = vadd.f32 %v165_v14, %v164_v12 }
 0x355   :  { %218 = vpush %v166_v15 }
 0x356   :  { %220 = vpush %v181_v16 }
 0x386   :  { %s219_s22 = spop %218 }
 0x387   :  { %s168_s23 = ssub.f32 %s219_s22, %s217_s0  ;;  %s221_s24 = spop %220 }
 0x388   :  { %s183_s25 = ssub.f32 %s221_s24, %s217_s0 }
 0x389   :  { %s171_s26 = smul.f32 0.125, %s168_s23 }
 0x38a   :  { %s186_s27 = smul.f32 0.125, %s183_s25 }
 0x38c   :  { %s187_s28 = sadd.f32 %s186_s27, %s171_s26 }
 0x38e   :  { %s188_s4 = smul.f32 0.5, %s187_s28 }
 0x390   :  { %v189_v17 = vstv %s188_s4 }
 0x391   :  { %190 = vst [vmem:[#allocation8] sm:$0x1] %v189_v17 }
 0x392   :  { %290 = shalt.err (!%p287_p0)
}
 0x393   :  { %200 = dma.vmem_to_hbm [thread:$0]  %s198_s30, 16, %s353_s3, [#allocation5]  }
 0x394   :  { %303 = dma.done.wait [#allocation5], 16  }
 0x395   :  { %304 = vsyncadd [#allocation5], 4294967280 }
 0x396   :  { %204 = vsyncpa [#allocation4], 1 }
 0x397   :  { %205 = vsyncpa [#allocation7], 1 }
 0x398   :  { %206 = vsyncpa [#allocation5], 1 }

</bundles_post_ra>
